<compile_context>
chip_gen: v7x
topology: tpu7x:2x2x1
jax: 0.10.0
libtpu: 0.0.40
codegen_flags: <defaults>
</compile_context>

<pallas_src>
import functools
import math

import jax
import jax.numpy as jnp
from jax.experimental import pallas as pl
from jax.experimental.pallas import tpu as pltpu

# ---- static hyperparameters (would come from `args` / `action_limit`) ----
LOG_STD_MIN = -20.0
LOG_STD_MAX = 2.0
ACTION_LIMIT_LOW = -1.0   # unused in forward, kept for parity with the module
ACTION_LIMIT_HIGH = 1.0

HALF_LOG_2PI = 0.5 * math.log(2.0 * math.pi)
LOG2 = math.log(2.0)


def _round_up(x, m):
    return (x + m - 1) // m * m


def _policy_kernel(x_ref, w1_ref, b1_ref, w2_ref, b2_ref,
                   wh_ref, bh_ref, eps_ref,          # fused head weight/bias, noise
                   out_ref,                          # (TM, 128) packed [act | logp | 0]
                   *, a1, a2):                       # PReLU slopes, baked as constants
    A = eps_ref.shape[-1]

    # fc1 + PReLU  (bf16 MXU matmul, f32 accumulate, f32 elementwise tail).
    # astype is a no-op when x already arrives in bf16 (preferred input contract).
    h1 = jnp.dot(x_ref[...].astype(jnp.bfloat16), w1_ref[...],
                 preferred_element_type=jnp.float32) + b1_ref[...]
    h1 = jnp.where(h1 >= 0.0, h1, a1 * h1)

    # fc2 + PReLU  (K=64, N=8: MXU-negligible on every generation)
    h2 = jnp.dot(h1.astype(jnp.bfloat16), w2_ref[...],
                 preferred_element_type=jnp.float32) + b2_ref[...]
    h2 = jnp.where(h2 >= 0.0, h2, a2 * h2)

    # fused heads: one tiny matmul produces [mu | log_std]; kept in f32 so the
    # exponentiated log_std (and hence log_pi) keeps full precision.
    heads = jnp.dot(h2, wh_ref[...], preferred_element_type=jnp.float32) + bh_ref[...]
    mu = heads[:, :A]
    log_std = jnp.clip(heads[:, A:], LOG_STD_MIN, LOG_STD_MAX)
    std = jnp.exp(log_std)

    # rsample (eps supplied from the wrapper for deterministic reproducibility)
    eps = eps_ref[...].astype(jnp.float32)
    pi = mu + std * eps

    # Normal(mu, std).log_prob(pi) summed over last axis; (pi - mu)/std == eps exactly
    logp = jnp.sum(-0.5 * eps * eps - log_std - HALF_LOG_2PI, axis=-1, keepdims=True)

    # tanh-squash correction: 2*(log 2 - pi - softplus(-2*pi)), summed over axis=1
    t = -2.0 * pi
    softplus_t = jnp.maximum(t, 0.0) + jnp.log1p(jnp.exp(-jnp.abs(t)))
    corr = 2.0 * (LOG2 - pi - softplus_t)
    logp = logp - jnp.sum(corr, axis=-1, keepdims=True)

    action = ACTION_LIMIT_HIGH * jnp.tanh(pi)

    # Lane-dense packed output tile: dense zero store, then two narrow sub-stores.
    # (Replaces the per-step concatenate + (tm, out_w-A-1) zero temp.)
    out_ref[...] = jnp.zeros_like(out_ref)
    out_ref[:, :A] = action.astype(out_ref.dtype)
    out_ref[:, A:A + 1] = logp.astype(out_ref.dtype)


def policy_forward(params, img_feats, eps, *, tm=512, out_dtype=jnp.bfloat16):
    """params: dict of pre-transposed (in, out) weights; img_feats: (B, feat_dim)
    (bf16 preferred, f32 accepted); eps: (B, A) rsample noise."""
    B, feat_dim = img_feats.shape
    A = eps.shape[-1]
    h1 = params["w1"].shape[1]
    h2 = params["w2"].shape[1]
    a1, a2 = params["alpha"]          # static Python floats -> baked into the kernel

    # Batch tile: multiple of 8 sublanes, capped by the (padded) batch.
    # tm=512 amortizes per-step overhead; B >= 2*tm gives >=2 grid steps so the
    # "parallel" axis can shard across both v7x TensorCores (for B <= tm the
    # second core is necessarily idle -- no way around that without extra padding).
    tm = min(tm, _round_up(B, 8))
    Bp = _round_up(B, tm)
    if Bp != B:                       # guard ragged batch by zero-padding rows
        img_feats = jnp.pad(img_feats, ((0, Bp - B), (0, 0)))
        eps = jnp.pad(eps, ((0, Bp - B), (0, 0)))

    out_w = max(128, _round_up(A + 1, 128))   # lane-dense packed output width
    grid = (pl.cdiv(Bp, tm),)

    kernel = functools.partial(_policy_kernel, a1=float(a1), a2=float(a2))

    out = pl.pallas_call(
        kernel,
        out_shape=jax.ShapeDtypeStruct((Bp, out_w), out_dtype),
        grid_spec=pltpu.PrefetchScalarGridSpec(
            num_scalar_prefetch=0,
            grid=grid,
            in_specs=[
                # x / eps tiles stream over the batch grid (auto double-buffered).
                pl.BlockSpec((tm, feat_dim), lambda i: (i, 0)),
                # Weights / biases: index_map -> (0,0) so they stay VMEM-resident.
                pl.BlockSpec((feat_dim, h1), lambda i: (0, 0)),
                pl.BlockSpec((1, h1), lambda i: (0, 0)),
                pl.BlockSpec((h1, h2), lambda i: (0, 0)),
                pl.BlockSpec((1, h2), lambda i: (0, 0)),
                pl.BlockSpec((h2, 2 * A), lambda i: (0, 0)),
                pl.BlockSpec((1, 2 * A), lambda i: (0, 0)),
                pl.BlockSpec((tm, A), lambda i: (i, 0)),
            ],
            out_specs=pl.BlockSpec((tm, out_w), lambda i: (i, 0)),
        ),
        compiler_params=pltpu.CompilerParams(
            dimension_semantics=("parallel",),   # shard batch steps across TCs (v7x)
        ),
    )(
        img_feats,
        params["w1"], params["b1"],
        params["w2"], params["b2"],
        params["wh"], params["bh"],
        eps,
    )

    # Wrapper-side slicing of the packed slab (layout plumbing, not compute).
    pi_action = out[:B, :A]
    log_pi = out[:B, A:A + 1].astype(jnp.float32)
    return pi_action, log_pi


def init_params(key, feat_dim, action_dim):
    """Xavier-uniform (gain=1) weights, zero biases, PReLU alpha=0.25.
    Linear weights stored transposed as (in_features, out_features); the two big
    matmul weights are bf16 (f32 accumulation on the MXU); the tiny fused head
    and all biases stay f32."""
    h1 = feat_dim // 8
    h2 = feat_dim // 64

    def xavier(k, fan_in, fan_out):
        bound = math.sqrt(6.0 / (fan_in + fan_out))
        return jax.random.uniform(k, (fan_in, fan_out), jnp.float32, -bound, bound)

    k1, k2, k3, k4 = jax.random.split(key, 4)
    wm = xavier(k3, h2, action_dim)      # mean head
    ws = xavier(k4, h2, action_dim)      # log_std head
    return {
        "w1": xavier(k1, feat_dim, h1).astype(jnp.bfloat16),
        "b1": jnp.zeros((1, h1), jnp.float32),
        "w2": xavier(k2, h1, h2).astype(jnp.bfloat16),
        "b2": jnp.zeros((1, h2), jnp.float32),
        # fused head: [mean | log_std]  (kept f32: only (h2, 2A), MXU-negligible)
        "wh": jnp.concatenate([wm, ws], axis=1),
        "bh": jnp.zeros((1, 2 * action_dim), jnp.float32),
        # PReLU defaults: single parameter each, init 0.25, frozen at inference ->
        # baked into the kernel as compile-time constants.
        "alpha": (0.25, 0.25),
    }


if __name__ == "__main__":
    B = 8
    FEAT_DIM = 512            # -> fc1: 512->64, fc2: 64->8
    ACTION_DIM = 4

    key = jax.random.PRNGKey(0)
    kp, kx, ke = jax.random.split(key, 3)

    params = init_params(kp, FEAT_DIM, ACTION_DIM)
    # Upstream feature extractor hands over bf16 directly (dominant HBM stream halved).
    img_feats = jax.random.normal(kx, (B, FEAT_DIM), jnp.float32).astype(jnp.bfloat16)
    eps = jax.random.normal(ke, (B, ACTION_DIM), jnp.float32)   # rsample noise

    pi_action, log_pi = policy_forward(params, img_feats, eps)
    jax.block_until_ready((pi_action, log_pi))

    assert pi_action.shape == (B, ACTION_DIM)
    assert log_pi.shape == (B, 1)
    assert bool(jnp.all(jnp.isfinite(pi_action.astype(jnp.float32))))
    assert bool(jnp.all(jnp.isfinite(log_pi)))
    assert bool(jnp.all(jnp.abs(pi_action.astype(jnp.float32)) <= ACTION_LIMIT_HIGH))
    print("KERNEL_OK")
</pallas_src>

<mosaic_0001>
module attributes {stable_mosaic.version = 11 : i64} {
  func.func @_policy_kernel(%arg0: i32, %arg1: memref<8x512xbf16, #tpu.memory_space<vmem>>, %arg2: memref<512x64xbf16, #tpu.memory_space<vmem>>, %arg3: memref<1x64xf32, #tpu.memory_space<vmem>>, %arg4: memref<64x8xbf16, #tpu.memory_space<vmem>>, %arg5: memref<1x8xf32, #tpu.memory_space<vmem>>, %arg6: memref<8x8xf32, #tpu.memory_space<vmem>>, %arg7: memref<1x8xf32, #tpu.memory_space<vmem>>, %arg8: memref<8x4xf32, #tpu.memory_space<vmem>>, %arg9: memref<8x128xbf16, #tpu.memory_space<vmem>>) attributes {dimension_semantics = [#tpu.dimension_semantics<parallel>], iteration_bounds = array<i64: 1>, scalar_prefetch = 0 : i64, scratch_operands = 0 : i64, tpu.core_type = #tpu.core_type<tc>, window_params = [{transform_indices = @transform_0, window_bounds = array<i64: 8, 512>}, {pipeline_mode = #tpu.pipeline_mode<synchronous>, transform_indices = @transform_1, window_bounds = array<i64: 512, 64>}, {pipeline_mode = #tpu.pipeline_mode<synchronous>, transform_indices = @transform_2, window_bounds = array<i64: 1, 64>}, {pipeline_mode = #tpu.pipeline_mode<synchronous>, transform_indices = @transform_3, window_bounds = array<i64: 64, 8>}, {pipeline_mode = #tpu.pipeline_mode<synchronous>, transform_indices = @transform_4, window_bounds = array<i64: 1, 8>}, {pipeline_mode = #tpu.pipeline_mode<synchronous>, transform_indices = @transform_5, window_bounds = array<i64: 8, 8>}, {pipeline_mode = #tpu.pipeline_mode<synchronous>, transform_indices = @transform_6, window_bounds = array<i64: 1, 8>}, {transform_indices = @transform_7, window_bounds = array<i64: 8, 4>}, {transform_indices = @transform_8, window_bounds = array<i64: 8, 128>}]} {
    %c0 = arith.constant 0 : index
    %c0_0 = arith.constant 0 : index
    %0 = vector.load %arg1[%c0, %c0_0] : memref<8x512xbf16, #tpu.memory_space<vmem>>, vector<8x512xbf16>
    %c0_1 = arith.constant 0 : index
    %c0_2 = arith.constant 0 : index
    %1 = vector.load %arg2[%c0_1, %c0_2] : memref<512x64xbf16, #tpu.memory_space<vmem>>, vector<512x64xbf16>
    %cst = arith.constant dense<0.000000e+00> : vector<8x64xf32>
    %2 = tpu.matmul %0, %1, %cst {dimension_numbers = #tpu.dot_dimension_numbers<[1], [0], [0], [1], [0, 0, 1, 1], [], []>} : vector<8x512xbf16>, vector<512x64xbf16>, vector<8x64xf32> -> vector<8x64xf32>
    %c0_3 = arith.constant 0 : index
    %c0_4 = arith.constant 0 : index
    %3 = vector.load %arg3[%c0_3, %c0_4] : memref<1x64xf32, #tpu.memory_space<vmem>>, vector<1x64xf32>
    %4 = vector.broadcast %3 : vector<1x64xf32> to vector<8x64xf32>
    %5 = arith.addf %2, %4 : vector<8x64xf32>
    %cst_5 = arith.constant 0.000000e+00 : f32
    %6 = vector.broadcast %cst_5 : f32 to vector<8x64xf32>
    %7 = arith.cmpf oge, %5, %6 : vector<8x64xf32>
    %cst_6 = arith.constant 2.500000e-01 : f32
    %8 = vector.broadcast %cst_6 : f32 to vector<8x64xf32>
    %9 = arith.mulf %8, %5 : vector<8x64xf32>
    %10 = arith.select %7, %5, %9 : vector<8x64xi1>, vector<8x64xf32>
    %11 = arith.truncf %10 : vector<8x64xf32> to vector<8x64xbf16>
    %c0_7 = arith.constant 0 : index
    %c0_8 = arith.constant 0 : index
    %12 = vector.load %arg4[%c0_7, %c0_8] : memref<64x8xbf16, #tpu.memory_space<vmem>>, vector<64x8xbf16>
    %cst_9 = arith.constant dense<0.000000e+00> : vector<8x8xf32>
    %13 = tpu.matmul %11, %12, %cst_9 {dimension_numbers = #tpu.dot_dimension_numbers<[1], [0], [0], [1], [0, 0, 1, 1], [], []>} : vector<8x64xbf16>, vector<64x8xbf16>, vector<8x8xf32> -> vector<8x8xf32>
    %c0_10 = arith.constant 0 : index
    %c0_11 = arith.constant 0 : index
    %14 = vector.load %arg5[%c0_10, %c0_11] : memref<1x8xf32, #tpu.memory_space<vmem>>, vector<1x8xf32>
    %15 = vector.broadcast %14 : vector<1x8xf32> to vector<8x8xf32>
    %16 = arith.addf %13, %15 : vector<8x8xf32>
    %cst_12 = arith.constant 0.000000e+00 : f32
    %17 = vector.broadcast %cst_12 : f32 to vector<8x8xf32>
    %18 = arith.cmpf oge, %16, %17 : vector<8x8xf32>
    %cst_13 = arith.constant 2.500000e-01 : f32
    %19 = vector.broadcast %cst_13 : f32 to vector<8x8xf32>
    %20 = arith.mulf %19, %16 : vector<8x8xf32>
    %21 = arith.select %18, %16, %20 : vector<8x8xi1>, vector<8x8xf32>
    %c0_14 = arith.constant 0 : index
    %c0_15 = arith.constant 0 : index
    %22 = vector.load %arg6[%c0_14, %c0_15] : memref<8x8xf32, #tpu.memory_space<vmem>>, vector<8x8xf32>
    %cst_16 = arith.constant dense<0.000000e+00> : vector<8x8xf32>
    %23 = tpu.matmul %21, %22, %cst_16 {dimension_numbers = #tpu.dot_dimension_numbers<[1], [0], [0], [1], [0, 0, 1, 1], [], []>} : vector<8x8xf32>, vector<8x8xf32>, vector<8x8xf32> -> vector<8x8xf32>
    %c0_17 = arith.constant 0 : index
    %c0_18 = arith.constant 0 : index
    %24 = vector.load %arg7[%c0_17, %c0_18] : memref<1x8xf32, #tpu.memory_space<vmem>>, vector<1x8xf32>
    %25 = vector.broadcast %24 : vector<1x8xf32> to vector<8x8xf32>
    %26 = arith.addf %23, %25 : vector<8x8xf32>
    %27 = vector.extract_strided_slice %26 {offsets = [0, 0], sizes = [8, 4], strides = [1, 1]} : vector<8x8xf32> to vector<8x4xf32>
    %28 = vector.extract_strided_slice %26 {offsets = [0, 4], sizes = [8, 4], strides = [1, 1]} : vector<8x8xf32> to vector<8x4xf32>
    %cst_19 = arith.constant -2.000000e+01 : f32
    %cst_20 = arith.constant 2.000000e+00 : f32
    %29 = vector.broadcast %cst_19 : f32 to vector<8x4xf32>
    %30 = arith.maximumf %29, %28 : vector<8x4xf32>
    %31 = vector.broadcast %cst_20 : f32 to vector<8x4xf32>
    %32 = arith.minimumf %31, %30 : vector<8x4xf32>
    %33 = math.exp %32 : vector<8x4xf32>
    %c0_21 = arith.constant 0 : index
    %c0_22 = arith.constant 0 : index
    %34 = vector.load %arg8[%c0_21, %c0_22] : memref<8x4xf32, #tpu.memory_space<vmem>>, vector<8x4xf32>
    %35 = arith.mulf %33, %34 : vector<8x4xf32>
    %36 = arith.addf %27, %35 : vector<8x4xf32>
    %cst_23 = arith.constant -5.000000e-01 : f32
    %37 = vector.broadcast %cst_23 : f32 to vector<8x4xf32>
    %38 = arith.mulf %37, %34 : vector<8x4xf32>
    %39 = arith.mulf %38, %34 : vector<8x4xf32>
    %40 = arith.subf %39, %32 : vector<8x4xf32>
    %cst_24 = arith.constant 0.918938517 : f32
    %41 = vector.broadcast %cst_24 : f32 to vector<8x4xf32>
    %42 = arith.subf %40, %41 : vector<8x4xf32>
    %cst_25 = arith.constant dense<0.000000e+00> : vector<8xf32>
    %43 = vector.multi_reduction <add>, %42, %cst_25 [1] : vector<8x4xf32> to vector<8xf32>
    %44 = vector.shape_cast %43 : vector<8xf32> to vector<8x1xf32>
    %cst_26 = arith.constant -2.000000e+00 : f32
    %45 = vector.broadcast %cst_26 : f32 to vector<8x4xf32>
    %46 = arith.mulf %45, %36 : vector<8x4xf32>
    %cst_27 = arith.constant 0.000000e+00 : f32
    %47 = vector.broadcast %cst_27 : f32 to vector<8x4xf32>
    %48 = arith.maximumf %46, %47 : vector<8x4xf32>
    %49 = math.absf %46 : vector<8x4xf32>
    %cst_28 = arith.constant 0.000000e+00 : f32
    %50 = vector.broadcast %cst_28 : f32 to vector<8x4xf32>
    %51 = arith.subf %50, %49 : vector<8x4xf32>
    %52 = math.exp %51 : vector<8x4xf32>
    %53 = math.log1p %52 : vector<8x4xf32>
    %54 = arith.addf %48, %53 : vector<8x4xf32>
    %cst_29 = arith.constant 0.693147182 : f32
    %55 = vector.broadcast %cst_29 : f32 to vector<8x4xf32>
    %56 = arith.subf %55, %36 : vector<8x4xf32>
    %57 = arith.subf %56, %54 : vector<8x4xf32>
    %cst_30 = arith.constant 2.000000e+00 : f32
    %58 = vector.broadcast %cst_30 : f32 to vector<8x4xf32>
    %59 = arith.mulf %58, %57 : vector<8x4xf32>
    %cst_31 = arith.constant dense<0.000000e+00> : vector<8xf32>
    %60 = vector.multi_reduction <add>, %59, %cst_31 [1] : vector<8x4xf32> to vector<8xf32>
    %61 = vector.shape_cast %60 : vector<8xf32> to vector<8x1xf32>
    %62 = arith.subf %44, %61 : vector<8x1xf32>
    %63 = math.tanh %36 : vector<8x4xf32>
    %cst_32 = arith.constant 1.000000e+00 : f32
    %64 = vector.broadcast %cst_32 : f32 to vector<8x4xf32>
    %65 = arith.mulf %64, %63 : vector<8x4xf32>
    %cst_33 = arith.constant 0.000000e+00 : bf16
    %66 = vector.broadcast %cst_33 : bf16 to vector<8x128xbf16>
    %c0_34 = arith.constant 0 : index
    %c0_35 = arith.constant 0 : index
    %67 = vector.load %arg9[%c0_34, %c0_35] : memref<8x128xbf16, #tpu.memory_space<vmem>>, vector<8x128xbf16>
    tpu.vector_store %arg9[%c0_34, %c0_35], %66 {strides = array<i32>} : memref<8x128xbf16, #tpu.memory_space<vmem>>, vector<8x128xbf16>,
    %68 = arith.truncf %65 : vector<8x4xf32> to vector<8x4xbf16>
    %c0_36 = arith.constant 0 : index
    %c0_37 = arith.constant 0 : index
    %69 = vector.load %arg9[%c0_36, %c0_37] : memref<8x128xbf16, #tpu.memory_space<vmem>>, vector<8x4xbf16>
    tpu.vector_store %arg9[%c0_36, %c0_37], %68 {strides = array<i32>} : memref<8x128xbf16, #tpu.memory_space<vmem>>, vector<8x4xbf16>,
    %70 = arith.truncf %62 : vector<8x1xf32> to vector<8x1xbf16>
    %c0_38 = arith.constant 0 : index
    %c4 = arith.constant 4 : index
    %71 = vector.load %arg9[%c0_38, %c4] : memref<8x128xbf16, #tpu.memory_space<vmem>>, vector<8x1xbf16>
    tpu.vector_store %arg9[%c0_38, %c4], %70 {strides = array<i32>} : memref<8x128xbf16, #tpu.memory_space<vmem>>, vector<8x1xbf16>,
    return
  }
  func.func @transform_0(%arg0: i32) -> (i32, i32) {
    %c0_i32 = arith.constant 0 : i32
    %c0_i32_0 = arith.constant 0 : i32
    return %arg0, %c0_i32 : i32, i32
  }
  func.func @transform_1(%arg0: i32) -> (i32, i32) {
    %c0_i32 = arith.constant 0 : i32
    %c0_i32_0 = arith.constant 0 : i32
    %c0_i32_1 = arith.constant 0 : i32
    return %c0_i32, %c0_i32_0 : i32, i32
  }
  func.func @transform_2(%arg0: i32) -> (i32, i32) {
    %c0_i32 = arith.constant 0 : i32
    %c0_i32_0 = arith.constant 0 : i32
    %c0_i32_1 = arith.constant 0 : i32
    return %c0_i32, %c0_i32_0 : i32, i32
  }
  func.func @transform_3(%arg0: i32) -> (i32, i32) {
    %c0_i32 = arith.constant 0 : i32
    %c0_i32_0 = arith.constant 0 : i32
    %c0_i32_1 = arith.constant 0 : i32
    return %c0_i32, %c0_i32_0 : i32, i32
  }
  func.func @transform_4(%arg0: i32) -> (i32, i32) {
    %c0_i32 = arith.constant 0 : i32
    %c0_i32_0 = arith.constant 0 : i32
    %c0_i32_1 = arith.constant 0 : i32
    return %c0_i32, %c0_i32_0 : i32, i32
  }
  func.func @transform_5(%arg0: i32) -> (i32, i32) {
    %c0_i32 = arith.constant 0 : i32
    %c0_i32_0 = arith.constant 0 : i32
    %c0_i32_1 = arith.constant 0 : i32
    return %c0_i32, %c0_i32_0 : i32, i32
  }
  func.func @transform_6(%arg0: i32) -> (i32, i32) {
    %c0_i32 = arith.constant 0 : i32
    %c0_i32_0 = arith.constant 0 : i32
    %c0_i32_1 = arith.constant 0 : i32
    return %c0_i32, %c0_i32_0 : i32, i32
  }
  func.func @transform_7(%arg0: i32) -> (i32, i32) {
    %c0_i32 = arith.constant 0 : i32
    %c0_i32_0 = arith.constant 0 : i32
    return %arg0, %c0_i32 : i32, i32
  }
  func.func @transform_8(%arg0: i32) -> (i32, i32) {
    %c0_i32 = arith.constant 0 : i32
    %c0_i32_0 = arith.constant 0 : i32
    return %arg0, %c0_i32 : i32, i32
  }
}

</mosaic_0001>

<bundles_post_ra>
// kernel: tpu_custom_call.1
= control target key start
LH: loop header
LB: loop body
LE: loop exit
PB: predicated region body
PF: predicated region fallthrough
CT: control target
= control target key end

     0   :  { %v826_v39 = vmov 0.0   ;;  %s1020_s0 = inlined_call_operand.vmem [shape: bf16[8,512], index: 0, kind: input, shape index: {}]   ;;  %s1021_s1 = inlined_call_operand.vmem [shape: bf16[512,64], index: 1, kind: input, shape index: {}]   ;;  %s1022_s2 = inlined_call_operand.vmem [shape: f32[1,64], index: 2, kind: input, shape index: {}]   ;;  %s1023_s3 = inlined_call_operand.vmem [shape: bf16[64,8], index: 3, kind: input, shape index: {}]   ;;  %s1024_s4 = inlined_call_operand.vmem [shape: f32[1,8], index: 4, kind: input, shape index: {}]   ;;  %s1025_s5 = inlined_call_operand.vmem [shape: f32[8,8], index: 5, kind: input, shape index: {}]   ;;  %s1026_s6 = inlined_call_operand.vmem [shape: f32[1,8], index: 6, kind: input, shape index: {}]   ;;  %s1027_s7 = inlined_call_operand.vmem [shape: f32[8,4], index: 7, kind: input, shape index: {}]   ;;  %s1028_s8 = inlined_call_operand.hbm [shape: bf16[8,128], index: 8, kind: output, shape index: {}]  }
   0x1   :  { %v754_v0 = vld [vmem:[%s1021_s1 + $0x40] sm:$0xff]   ;;  %v758_v4 = vld [vmem:[%s1021_s1 + $0x48] sm:$0xff]   ;;  %v762_v8 = vld [vmem:[%s1021_s1 + $0x50] sm:$0xff]  }
   0x2   :  { %v755_v1 = vld [vmem:[%s1021_s1 + $0xc0] sm:$0xff]   ;;  %680 = vmatprep.subr.bf16.mxu0 %v754_v0  ;;  %v759_v5 = vld [vmem:[%s1021_s1 + $0xc8] sm:$0xff]   ;;  %v763_v9 = vld [vmem:[%s1021_s1 + $0xd0] sm:$0xff]  }
   0x3   :  { %v756_v2 = vld [vmem:[%s1021_s1] sm:$0xff]   ;;  %702 = vmatprep.subr.bf16.mxu1 %v755_v1  ;;  %v760_v6 = vld [vmem:[%s1021_s1 + $0x8] sm:$0xff]   ;;  %v764_v10 = vld [vmem:[%s1021_s1 + $0x10] sm:$0xff]  }
   0x4   :  { %v757_v3 = vld [vmem:[%s1021_s1 + $0x80] sm:$0xff]   ;;  %681 = vmatpush3.bf16.msra.mxu0 %v756_v2  ;;  %v761_v7 = vld [vmem:[%s1021_s1 + $0x88] sm:$0xff]   ;;  %v765_v11 = vld [vmem:[%s1021_s1 + $0x90] sm:$0xff]  }
   0x5   :  { %703 = vmatpush3.bf16.msra.mxu1 %v757_v3  ;;  %682 = vmatprep.subr.bf16.mxu0 %v758_v4  ;;  %v766_v12 = vld [vmem:[%s1021_s1 + $0x58] sm:$0xff]   ;;  %v770_v16 = vld [vmem:[%s1021_s1 + $0x60] sm:$0xff]   ;;  %v774_v20 = vld [vmem:[%s1021_s1 + $0x68] sm:$0xff]  }
   0x6   :  { %704 = vmatprep.subr.bf16.mxu1 %v759_v5  ;;  %v767_v13 = vld [vmem:[%s1021_s1 + $0xd8] sm:$0xff]   ;;  %v771_v17 = vld [vmem:[%s1021_s1 + $0xe0] sm:$0xff]   ;;  %v775_v21 = vld [vmem:[%s1021_s1 + $0xe8] sm:$0xff]  }
   0x7   :  { %v768_v14 = vld [vmem:[%s1021_s1 + $0x18] sm:$0xff]   ;;  %v772_v18 = vld [vmem:[%s1021_s1 + $0x20] sm:$0xff]   ;;  %v776_v22 = vld [vmem:[%s1021_s1 + $0x28] sm:$0xff]  }
   0x8   :  { %683 = vmatpush3.bf16.msra.mxu0 %v760_v6  ;;  %v769_v15 = vld [vmem:[%s1021_s1 + $0x98] sm:$0xff]   ;;  %v773_v19 = vld [vmem:[%s1021_s1 + $0xa0] sm:$0xff]   ;;  %v777_v23 = vld [vmem:[%s1021_s1 + $0xa8] sm:$0xff]  }
   0x9   :  { %705 = vmatpush3.bf16.msra.mxu1 %v761_v7  ;;  %684 = vmatprep.subr.bf16.mxu0 %v762_v8  ;;  %v778_v24 = vld [vmem:[%s1021_s1 + $0x70] sm:$0xff]   ;;  %v782_v28 = vld [vmem:[%s1021_s1 + $0x78] sm:$0xff]   ;;  %v31_v32 = vld [vmem:[%s1020_s0] sm:$0xff] }
   0xa   :  { %706 = vmatprep.subr.bf16.mxu1 %v763_v9  ;;  %v779_v25 = vld [vmem:[%s1021_s1 + $0xf0] sm:$0xff]   ;;  %v783_v29 = vld [vmem:[%s1021_s1 + $0xf8] sm:$0xff]   ;;  %v32_v33 = vld [vmem:[%s1020_s0 + $0x8] sm:$0xff]  ;;  %v635_v34 = vcombine.low %v31_v32, %v31_v32  ;;  %v636_v35 = vcombine.high %v31_v32, %v31_v32 }
   0xb   :  { %v780_v26 = vld [vmem:[%s1021_s1 + $0x30] sm:$0xff]   ;;  %v784_v30 = vld [vmem:[%s1021_s1 + $0x38] sm:$0xff]   ;;  %v637_v36 = vcombine.low %v32_v33, %v32_v33  ;;  %v638_v37 = vcombine.high %v32_v33, %v32_v33  ;;  %v790_v38 = vld [vmem:[%s1023_s3] sm:$0xff]  }
   0xc   :  { %685 = vmatpush3.bf16.msra.mxu0 %v764_v10  ;;  %v781_v27 = vld [vmem:[%s1021_s1 + $0xb0] sm:$0xff]   ;;  %v785_v31 = vld [vmem:[%s1021_s1 + $0xb8] sm:$0xff]   ;;  %342 = vmatprep.mubr.bf16.mxu0 %v636_v35 }
   0xd   :  { %707 = vmatpush3.bf16.msra.mxu1 %v765_v11  ;;  %686 = vmatprep.subr.bf16.mxu0 %v766_v12 }
   0xe   :  { %708 = vmatprep.subr.bf16.mxu1 %v767_v13  ;;  %382 = vmatprep.mubr.bf16.mxu1 %v638_v37 }
  0x10   :  { %687 = vmatpush3.bf16.msra.mxu0 %v768_v14 }
  0x11   :  { %709 = vmatpush3.bf16.msra.mxu1 %v769_v15  ;;  %688 = vmatprep.subr.bf16.mxu0 %v770_v16 }
  0x12   :  { %710 = vmatprep.subr.bf16.mxu1 %v771_v17 }
  0x14   :  { %689 = vmatpush3.bf16.msra.mxu0 %v772_v18 }
  0x15   :  { %711 = vmatpush3.bf16.msra.mxu1 %v773_v19  ;;  %690 = vmatprep.subr.bf16.mxu0 %v774_v20 }
  0x16   :  { %712 = vmatprep.subr.bf16.mxu1 %v775_v21 }
  0x18   :  { %691 = vmatpush3.bf16.msra.mxu0 %v776_v22 }
  0x19   :  { %713 = vmatpush3.bf16.msra.mxu1 %v777_v23  ;;  %692 = vmatprep.subr.bf16.mxu0 %v778_v24 }
  0x1a   :  { %714 = vmatprep.subr.bf16.mxu1 %v779_v25 }
  0x1c   :  { %693 = vmatpush3.bf16.msra.mxu0 %v780_v26 }
  0x1d   :  { %715 = vmatpush3.bf16.msra.mxu1 %v781_v27  ;;  %694 = vmatprep.subr.bf16.mxu0 %v782_v28 }
  0x1e   :  { %716 = vmatprep.subr.bf16.mxu1 %v783_v29 }
  0x20   :  { %695 = vmatpush3.bf16.msra.mxu0 %v784_v30 }
  0x21   :  { %717 = vmatpush3.bf16.msra.mxu1 %v785_v31  ;;  %731 = vmatprep.subr.bf16.mxu0 %v826_v39 }
  0x22   :  { %743 = vmatprep.subr.mxu1 %v826_v39 }
  0x23   :  { %13 = vsyncpa [#allocation3], 0  ;;  %343 = vmatmul.mubr.bf16.vlgmr.msra.gmra.mrb[0].mxu0 %v635_v34  ;;  %v791_v40 = vld [vmem:[%s1023_s3 + $0x8] sm:$0xff]   ;;  %v792_v41 = vld [vmem:[%s1023_s3 + $0x10] sm:$0xff]   ;;  %vm827_vm0 = vmmov 0   ;;  %vm433_vm2 = vcmask 523264  }
  0x24   :  { %383 = vmatmul.mubr.bf16.vlgmr.msra.gmra.mrb[0].mxu1 %v637_v36  ;;  %732 = vmatpush3.bf16.msra.mxu0 %v790_v38  ;;  %v793_v42 = vld [vmem:[%s1023_s3 + $0x18] sm:$0xff]   ;;  %v480_v43 = vld [vmem:[%s1025_s5] sm:$0xff]  ;;  %vm488_vm4 = vcmask 64512   ;;  %v830_v15 = vmov 0   ;;  %vm585_vm5 = vcmask 31744   ;;  %vm615_vm6 = vcmask 27648  }
  0x25   :  { %733 = vmatprep.subr.bf16.mxu0 %v826_v39  ;;  %739 = vmatprep.mubr.msk.bf16.mxu0 %vm827_vm0, %v826_v39  ;;  %v634_v46 = vld [vmem:[%s1022_s2] ss:$0 sm:$0xff]  ;;  %s828_s2 = smov 4   ;;  %613 = vst [vmem:[#allocation2] sm:$0xf] %v830_v15  ;;  %vm618_vm8 = vcmask 35872  }
  0x26   :  { %745 = vmatprep.mubr.msk.f32.mxu1 %vm827_vm0, %v826_v39  ;;  %744 = vmatpush3.msra.mxu1 %v480_v43  ;;  %v566_v60 = vld [vmem:[%s1027_s7] sm:$0xff] }
  0x27   :  { %568 = vrot.lane.b32.xlu0 %v566_v60, %s828_s2  ;;  %v671_v61 = vld [vmem:[%s1024_s4] ss:$0 sm:$0xff]  ;;  %s829_s4 = smov 124   ;;  %v577_v16 = vmul.f32 -0.5, %v566_v60 }
  0x28   :  { %734 = vmatpush3.bf16.msra.mxu0 %v791_v40  ;;  %v677_v5 = vld [vmem:[%s1026_s6] ss:$0 sm:$0xff]  ;;  %s831_s6 = smov [#allocation2]  }
  0x29   :  { %735 = vmatprep.subr.bf16.mxu0 %v826_v39  ;;  %v578_v17 = vmul.f32 %v577_v16, %v566_v60  ;;  %s626_s7 = sshll.u32 %s831_s6, 4  ;;  %s627_s7 = int_to_ptr.vmem [resolvable:$true] %s626_s7 }
  0x2a   :  { %s802_s21 = scalar_lea.vmem %s627_s7, 64  ;;  %p807_p1 = scmp.lt.s32.totalorder %s627_s7, %s627_s7 }
  0x2b   :  { %p803_p0 = scmp.ne.s32.totalorder %s627_s7, %s802_s21  ;;  %p808_p2 = scmp.lt.s32.totalorder %s802_s21, %s802_s21 }
  0x2c   :  { %736 = vmatpush3.bf16.msra.mxu0 %v792_v41 }
  0x2d   :  { %737 = vmatprep.subr.bf16.mxu0 %v826_v39  ;;  %p809_p3 = por %p808_p2, %p807_p1 }
  0x2f   :  { %p810_p4 = pnand %p809_p3, %p803_p0 }
  0x30   :  { %738 = vmatpush3.bf16.msra.mxu0 %v793_v42 }
  0x99   :  { %v569_v12 = vpop.permute.xlu0 %568 }
  0xf6   :  { %v696_v44 = vpop.f32.mrb[0].mxu0 }
  0xf7   :  { %v718_v45 = vpop.f32.mrb[0].mxu1  ;;  %v697_v47 = vpop.f32.mrb[1].mxu0 }
  0xf8   :  { %v719_v48 = vpop.f32.mrb[1].mxu1  ;;  %v698_v49 = vadd.f32 %v697_v47, %v696_v44  ;;  %v699_v51 = vpop.f32.mrb[2].mxu0 }
  0xf9   :  { %v720_v50 = vadd.f32 %v719_v48, %v718_v45  ;;  %v721_v52 = vpop.f32.mrb[2].mxu1  ;;  %v700_v53 = vpop.f32.mrb[3].mxu0 }
  0xfa   :  { %v722_v54 = vpop.f32.mrb[3].mxu1  ;;  %v345_v55 = vadd.f32 %v698_v49, %v634_v46 }
  0xfc   :  { %v385_v56 = vadd.f32 %v720_v50, %v345_v55 }
  0xfe   :  { %vm390_vm1 = vcmp.ge.f32.partialorder %v385_v56, 0.0  ;;  %v391_v57 = vmul.f32 0.25, %v385_v56 }
 0x100   :  { %v392_v58 = vsel %vm390_vm1, %v385_v56, %v391_v57 }
 0x101   :  { %v393_v59 = vpack.c.bf16 %v392_v58, %v392_v58 }
 0x103   :  { %740 = vmatmul.mubr.msk.bf16.vlgmr.msra.gmra.mrb[4].mxu0 %vm433_vm2, %v393_v59 }
 0x1d6   :  { %v471_v62 = vpop.f32.mrb[4].mxu0 }
 0x1d7   :  { %v472_v63 = vadd.f32 %v671_v61, %v471_v62  ;;  %v741_v0 = vpop.f32.mrb[5].mxu0 }
 0x1d8   :  { %v474_v1 = vpop.f32.mrb[6].mxu0 }
 0x1d9   :  { %vm477_vm3 = vcmp.ge.f32.partialorder %v472_v63, 0.0  ;;  %v478_v2 = vmul.f32 0.25, %v472_v63  ;;  %v742_v3 = vpop.f32.mrb[7].mxu0 }
 0x1db   :  { %v479_v4 = vsel %vm477_vm3, %v472_v63, %v478_v2 }
 0x1dc   :  { %746 = vmatmul.mubr.msk.f32.vlgmr.msra.gmra.mrb[4].mxu1 %vm488_vm4, %v479_v4 }
 0x2af   :  { %v558_v6 = vpop.f32.mrb[4].mxu1 }
 0x2b0   :  { %v559_v7 = vadd.f32 %v677_v5, %v558_v6  ;;  %v747_v8 = vpop.f32.mrb[5].mxu1 }
 0x2b2   :  { %v562_v9 = vmax.f32 %v559_v7, -20.0 }
 0x2b4   :  { %v563_v10 = vmin.f32 %v562_v9, 2.0 }
 0x2b6   :  { %580 = vrot.lane.b32.xlu1 %v563_v10, %s829_s4  ;;  %v564_v11 = vmul.f32 1.442695, %v563_v10 }
 0x2b8   :  { %794 = vpow2.f32 %v564_v11 }
 0x2c2   :  { %v795_v13 = vpop.eup %794 }
 0x2c3   :  { %v571_v14 = vmul.f32 %v795_v13, %v569_v12 }
 0x2c5   :  { %573 = vrot.lane.b32.xlu0 %v571_v14, %s829_s4 }
 0x328   :  { %v581_v18 = vpop.permute.xlu1 %580 }
 0x329   :  { %v583_v19 = vsub.f32 %v578_v17, %v581_v18 }
 0x32b   :  { %v679_v20 = vadd.f32 -0.9189385, %v583_v19 }
 0x32d   :  { %v586_v21 = vsel %vm585_vm5, %v679_v20, 0.0 }
 0x32e   :  { %587 = vadd.xlane.f32.xlu1 %v586_v21 }
 0x337   :  { %v574_v22 = vpop.permute.xlu0 %573 }
 0x338   :  { %v576_v23 = vadd.f32 %v574_v22, %v559_v7 }
 0x33a   :  { %v589_v24 = vmul.f32 -2.0, %v576_v23  ;;  %796 = vtanh.f32 %v576_v23  ;;  %v605_v41 = vsub.f32 0.6931472, %v576_v23 }
 0x33c   :  { %v591_v25 = vand.u32 2147483647, %v589_v24  ;;  %v590_v38 = vmax.f32 %v589_v24, 0.0 }
 0x33e   :  { %v592_v26 = vsub.f32 0.0, %v591_v25 }
 0x340   :  { %v593_v27 = vmul.f32 1.442695, %v592_v26 }
 0x342   :  { %798 = vpow2.f32 %v593_v27 }
 0x344   :  { %v797_v28 = vpop.eup %796 }
 0x345   :  { %v614_v29 = vpack.c.bf16 %v797_v28, %v797_v28 }
 0x347   :  { %616 = vst.msk [vmem:[#allocation2] sm:$0xf] %vm615_vm6, %v614_v29 }
 0x34c   :  { %v799_v30 = vpop.eup %798 }
 0x34d   :  { %v595_v31 = vadd.f32 1.0, %v799_v30  ;;  %v598_v32 = vmul.f32 -0.5, %v799_v30  ;;  %v601_v34 = vand.u32 2147483647, %v799_v30 }
 0x34f   :  { %800 = vlog2.f32 %v595_v31  ;;  %v599_v33 = vadd.f32 1.0, %v598_v32  ;;  %vm602_vm7 = vcmp.lt.f32.partialorder %v601_v34, 0.0004427343 }
 0x351   :  { %v600_v37 = vmul.f32 %v799_v30, %v599_v33 }
 0x359   :  { %v801_v35 = vpop.eup %800 }
 0x35a   :  { %v597_v36 = vmul.f32 0.6931472, %v801_v35 }
 0x35c   :  { %v603_v39 = vsel %vm602_vm7, %v600_v37, %v597_v36 }
 0x35d   :  { %v604_v40 = vadd.f32 %v603_v39, %v590_v38 }
 0x35f   :  { %v606_v42 = vsub.f32 %v605_v41, %v604_v40 }
 0x361   :  { %v607_v43 = vmul.f32 2.0, %v606_v42 }
 0x363   :  { %v608_v44 = vsel %vm585_vm5, %v607_v43, 0.0 }
 0x364   :  { %609 = vadd.xlane.f32.xlu0 %v608_v44 }
 0x3bb   :  { %v588_v45 = vpop.xlane.xlu1 %587 }
 0x3f1   :  { %v610_v46 = vpop.xlane.xlu0 %609 }
 0x3f2   :  { %v611_v47 = vsub.f32 %v588_v45, %v610_v46 }
 0x3f4   :  { %v617_v48 = vpack.c.bf16 %v611_v47, %v611_v47 }
 0x3f6   :  { %619 = vst.msk [vmem:[#allocation2] sm:$0xf] %vm618_vm8, %v617_v48 }
 0x3f7   :  { %813 = shalt.err (!%p810_p4)
}
 0x3f8   :  { %s814_s24 = scalar_lea.hbm %s1028_s8, 64 }
 0x3f9   :  { %p815_p5 = scmp.ne.s32.totalorder %s1028_s8, %s814_s24  ;;  %p818_p6 = scmp.lt.u32.totalorder %s814_s24, %s1028_s8 }
 0x3fb   :  { %p820_p7 = pnand %p818_p6, %p815_p5 }
 0x3fd   :  { %823 = shalt.err (!%p820_p7)
}
 0x3fe   :  { %629 = dma.vmem_to_hbm [thread:$0]  %s627_s7, 64, %s1028_s8, [#allocation3]  }
 0x3ff   :  { %824 = dma.done.wait [#allocation3], 64  }
 0x400   :  { %825 = vsyncadd [#allocation3], 4294967232 }
 0x401   :  { %633 = vsyncpa [#allocation3], 1 }

</bundles_post_ra>
